<compile_context>
chip_gen: v7x
topology: tpu7x:2x2x1
jax: 0.10.0
libtpu: 0.0.40
codegen_flags: <defaults>
</compile_context>

<pallas_src>
import functools

import jax
import jax.numpy as jnp
from jax import lax
from jax.experimental import pallas as pl
from jax.experimental.pallas import tpu as pltpu


# ----------------------------- kernel ----------------------------------------


def _pool_kernel(x_ref, o_ref, *scratch, pool_type, K, S, P, H, W, OH, OW,
                 pad_val):
    """Separable 2-D pooling over one lane block.

    x_ref:   (H,  W,  Lb)  unpadded input block (lanes = fused N*C)
    o_ref:   (OH, OW, Lb)  output block
    scratch: [xp_ref (Hp, Wp, Lb)]  only when P > 0 (padded halo copy)
             [tmp_ref (OH, Wp, Lb)] row-reduced intermediate (f32 for avg)
    """
    is_avg = pool_type == "avg"
    if P > 0:
        xp_ref, tmp_ref = scratch
    else:
        (tmp_ref,) = scratch
    acc_dt = tmp_ref.dtype

    def red(a, b):
        return a + b if is_avg else jnp.maximum(a, b)

    # --- in-kernel spatial padding (VMEM-only; no padded copy in HBM) --------
    if P > 0:
        xp_ref[...] = jnp.full(xp_ref.shape, pad_val, dtype=xp_ref.dtype)
        xp_ref[pl.ds(P, H), pl.ds(P, W), :] = x_ref[...]
        src = xp_ref
    else:
        src = x_ref

    # --- pass 1: reduce kh along the leading (row) axis -----------------------
    # dim 0 is not a vreg axis, so strided slices here are cheap address math.
    acc = None
    for kh in range(K):
        rows = (src[pl.ds(kh, OH, stride=S), :, :] if S > 1
                else src[pl.ds(kh, OH), :, :])
        rows = rows.astype(acc_dt)
        acc = rows if acc is None else red(acc, rows)
    tmp_ref[...] = acc

    # --- pass 2: reduce kw along sublanes (stride-S subsample fused) ---------
    # K sublane slices instead of the previous K*K strided sublane taps.
    out = None
    for kw in range(K):
        cols = (tmp_ref[:, pl.ds(kw, OW, stride=S), :] if S > 1
                else tmp_ref[:, pl.ds(kw, OW), :])
        out = cols if out is None else red(out, cols)

    if is_avg:
        # count_include_pad=False divisor, computed analytically at lane width
        # 1 and broadcast over lanes (removes lane_blk-wide redundant int math).
        oh = lax.broadcasted_iota(jnp.int32, (OH, OW, 1), 0)
        ow = lax.broadcasted_iota(jnp.int32, (OH, OW, 1), 1)
        h0 = oh * S - P
        w0 = ow * S - P
        hc = jnp.minimum(h0 + K, H) - jnp.maximum(h0, 0)
        wc = jnp.minimum(w0 + K, W) - jnp.maximum(w0, 0)
        cnt = jnp.maximum(hc * wc, 1).astype(jnp.float32)
        # Exact reciprocal on a (OH, OW, 1) tensor: negligible cost, keeps
        # results bit-faithful to sum/count (approx=True would perturb ~2^-12).
        out = out * (1.0 / cnt)

    o_ref[...] = out.astype(o_ref.dtype)


# ----------------------------- helpers ----------------------------------------


def _out_size(x, K, S, P):
    return (x + 2 * P - K) // S + 1


def _pad_value(pool_type, dtype):
    if pool_type == "avg":
        return 0
    if jnp.issubdtype(dtype, jnp.floating):
        return -jnp.inf
    return jnp.iinfo(dtype).min


def _vmem_capacity_bytes():
    try:
        return int(pltpu.get_tpu_info().vmem_capacity_bytes)
    except Exception:
        return 64 << 20            # v7x-sized conservative fallback


def _choose_lane_block(L, per_lane_bytes, budget_bytes):
    """Largest 128-multiple lane block fitting the VMEM budget; prefer a grid
    of length >= 2 so v7x megacore can shard lane blocks across TensorCores."""
    if L <= 128:
        return L, L                # full-extent single block
    L_pad = -(-L // 128) * 128
    cands = [b for b in (1024, 512, 256, 128)
             if L_pad % b == 0 and per_lane_bytes * b <= budget_bytes]
    if not cands:
        # TODO(synk): for very large spatial extents, add an output-row grid
        # axis with halo'd input blocks instead of shrinking lanes further.
        cands = [128]
    multi = [b for b in cands if L_pad // b >= 2]
    return L_pad, (max(multi) if multi else max(cands))


# ----------------------------- wrappers ----------------------------------------


def pool_lanes_last(x, pool_type, kernel_size, stride, padding):
    """Pooling on a lanes-last (H, W, L) array, L = fused batch*channels.

    Zero HBM layout copies: the spatial halo is padded inside the kernel, so
    callers that keep a channels-last activation layout pay only the kernel's
    own read + write. Returns (OH, OW, L)."""
    H, W, L = x.shape
    K, S, P = int(kernel_size), int(stride), int(padding)
    pool_type = pool_type.lower()
    if pool_type not in ("max", "avg"):
        raise ValueError(pool_type)
    OH, OW = _out_size(H, K, S, P), _out_size(W, K, S, P)
    Hp, Wp = H + 2 * P, W + 2 * P
    assert OH >= 1 and OW >= 1 and P >= 0 and K >= 1

    pad_val = _pad_value(pool_type, x.dtype)
    acc_dt = jnp.float32 if pool_type == "avg" else x.dtype
    isz = jnp.dtype(x.dtype).itemsize
    aisz = jnp.dtype(acc_dt).itemsize

    # Per-lane VMEM footprint: double-buffered in/out blocks + halo scratch +
    # row-reduced scratch + headroom for the register-resident accumulators.
    per_lane = (isz * (2 * H * W + 2 * OH * OW + (Hp * Wp if P > 0 else 0))
                + aisz * (2 * OH * Wp + OH * OW))
    vmem_cap = _vmem_capacity_bytes()
    L_pad, lane_blk = _choose_lane_block(L, per_lane, (vmem_cap * 2) // 5)

    if L_pad != L:
        x = jnp.pad(x, ((0, 0), (0, 0), (0, L_pad - L)))

    grid = (L_pad // lane_blk,)
    needed = per_lane * lane_blk
    vmem_limit = int(min((vmem_cap * 9) // 10,
                         max(2 * needed + (4 << 20), 32 << 20)))

    scratch = []
    if P > 0:
        scratch.append(pltpu.VMEM((Hp, Wp, lane_blk), x.dtype))
    scratch.append(pltpu.VMEM((OH, Wp, lane_blk), acc_dt))

    kernel = functools.partial(
        _pool_kernel, pool_type=pool_type, K=K, S=S, P=P, H=H, W=W,
        OH=OH, OW=OW, pad_val=pad_val)

    cost = pl.CostEstimate(
        flops=2 * K * OH * OW * L_pad,
        transcendentals=0,
        bytes_accessed=(H * W + OH * OW) * L_pad * isz)

    out = pl.pallas_call(
        kernel,
        out_shape=jax.ShapeDtypeStruct((OH, OW, L_pad), x.dtype),
        grid=grid,
        in_specs=[pl.BlockSpec((H, W, lane_blk), lambda j: (0, 0, j))],
        out_specs=pl.BlockSpec((OH, OW, lane_blk), lambda j: (0, 0, j)),
        scratch_shapes=scratch,
        compiler_params=pltpu.CompilerParams(
            dimension_semantics=("parallel",),
            vmem_limit_bytes=vmem_limit),
        cost_estimate=cost,
    )(x)

    return out[:, :, :L] if L_pad != L else out


def _pool_reduce_window_nchw(x, pool_type, K, S, P):
    """XLA reduce_window pooling (NCHW). Small-N*C fallback and reference."""
    pad = [(0, 0), (0, 0), (P, P), (P, P)]
    dims, strides = (1, 1, K, K), (1, 1, S, S)
    if pool_type.lower() == "max":
        init = (-jnp.inf if jnp.issubdtype(x.dtype, jnp.floating)
                else jnp.iinfo(x.dtype).min)
        return lax.reduce_window(x, jnp.asarray(init, x.dtype), lax.max,
                                 dims, strides, pad)
    s = lax.reduce_window(x, jnp.asarray(0, x.dtype), lax.add,
                          dims, strides, pad)
    cnt = lax.reduce_window(jnp.ones_like(x), jnp.asarray(0, x.dtype),
                            lax.add, dims, strides, pad)
    return s / cnt


@functools.partial(jax.jit, static_argnums=(1, 2, 3, 4))
def pool(x, pool_type, kernel_size, stride, padding):
    """Equivalent of Pool(pool_type, kernel_size, stride, padding)(x), NCHW.

    The NCHW<->lanes-last transposes around the kernel are the cost of keeping
    the PyTorch interface; models that can carry a channels-last activation
    layout should call `pool_lanes_last` directly (no layout copies at all)."""
    N, C, H, W = x.shape
    NC = N * C
    if NC < 128:
        # < 128 fused lanes => masked partial stores / ~6% lane utilisation;
        # XLA's reduce_window wins in this regime (review feedback).
        return _pool_reduce_window_nchw(x, pool_type, kernel_size, stride,
                                        padding)
    xt = jnp.transpose(x, (2, 3, 0, 1)).reshape(H, W, NC)
    out = pool_lanes_last(xt, pool_type, kernel_size, stride, padding)
    OH, OW = out.shape[0], out.shape[1]
    return jnp.transpose(out.reshape(OH, OW, N, C), (2, 3, 0, 1))


# ----------------------------- main -------------------------------------------


if __name__ == "__main__":
    key = jax.random.PRNGKey(0)

    # Lane-dense shapes (N*C >= 128) exercise the Pallas kernel path.
    x = jax.random.normal(key, (2, 64, 16, 16), dtype=jnp.float32)    # NC = 128
    x2 = jax.random.normal(key, (2, 80, 16, 16), dtype=jnp.float32)   # NC = 160

    configs = [("max", 3, 2, 1), ("avg", 3, 2, 1),   # ENAS reduction cell
               ("max", 3, 1, 1), ("avg", 3, 1, 1),   # stride-1 (normal cell)
               ("max", 2, 2, 0),                     # no-padding path
               ("avg", 5, 1, 2)]                     # larger window
    for pt, K, S, P in configs:
        out = jax.block_until_ready(pool(x, pt, K, S, P))
        ref = _pool_reduce_window_nchw(x, pt, K, S, P)
        assert out.shape == ref.shape, (pt, K, S, P, out.shape, ref.shape)
        assert jnp.allclose(out, ref, atol=1e-5, rtol=1e-5), (pt, K, S, P)

    # Lane padding (160 -> 256) + multi-block grid.
    out2 = jax.block_until_ready(pool(x2, "max", 3, 2, 1))
    ref2 = _pool_reduce_window_nchw(x2, "max", 3, 2, 1)
    assert jnp.allclose(out2, ref2, atol=1e-5, rtol=1e-5)

    # Small N*C (toy 2x4 case) dispatches to the reduce_window fallback.
    xs = jax.random.normal(key, (2, 4, 16, 16), dtype=jnp.float32)
    out_s = jax.block_until_ready(pool(xs, "avg", 3, 2, 1))
    assert out_s.shape == (2, 4, 8, 8)
    assert jnp.allclose(out_s, _pool_reduce_window_nchw(xs, "avg", 3, 2, 1),
                        atol=1e-5, rtol=1e-5)

    print("KERNEL_OK")
</pallas_src>

<mosaic_0001>
module attributes {stable_mosaic.version = 11 : i64} {
  func.func @_pool_kernel(%arg0: i32, %arg1: memref<16x16x128xf32, #tpu.memory_space<vmem>>, %arg2: memref<8x8x128xf32, #tpu.memory_space<vmem>>, %arg3: memref<18x18x128xf32, #tpu.memory_space<vmem>>, %arg4: memref<8x18x128xf32, #tpu.memory_space<vmem>>) attributes {dimension_semantics = [#tpu.dimension_semantics<parallel>], iteration_bounds = array<i64: 1>, scalar_prefetch = 0 : i64, scratch_operands = 2 : i64, tpu.core_type = #tpu.core_type<tc>, window_params = [{transform_indices = @transform_0, window_bounds = array<i64: 16, 16, 128>}, {transform_indices = @transform_1, window_bounds = array<i64: 8, 8, 128>}]} {
    %cst = arith.constant 0xFF800000 : f32
    %0 = vector.broadcast %cst : f32 to vector<18x18x128xf32>
    %c0 = arith.constant 0 : index
    %c0_0 = arith.constant 0 : index
    %c0_1 = arith.constant 0 : index
    %1 = vector.load %arg3[%c0, %c0_0, %c0_1] : memref<18x18x128xf32, #tpu.memory_space<vmem>>, vector<18x18x128xf32>
    tpu.vector_store %arg3[%c0, %c0_0, %c0_1], %0 {strides = array<i32>} : memref<18x18x128xf32, #tpu.memory_space<vmem>>, vector<18x18x128xf32>,
    %c0_2 = arith.constant 0 : index
    %c0_3 = arith.constant 0 : index
    %c0_4 = arith.constant 0 : index
    %2 = vector.load %arg1[%c0_2, %c0_3, %c0_4] : memref<16x16x128xf32, #tpu.memory_space<vmem>>, vector<16x16x128xf32>
    %c1 = arith.constant 1 : index
    %c1_5 = arith.constant 1 : index
    %c0_6 = arith.constant 0 : index
    %3 = vector.load %arg3[%c1, %c1_5, %c0_6] : memref<18x18x128xf32, #tpu.memory_space<vmem>>, vector<16x16x128xf32>
    tpu.vector_store %arg3[%c1, %c1_5, %c0_6], %2 {strides = array<i32>} : memref<18x18x128xf32, #tpu.memory_space<vmem>>, vector<16x16x128xf32>,
    %c0_7 = arith.constant 0 : index
    %c0_8 = arith.constant 0 : index
    %c0_9 = arith.constant 0 : index
    %4 = tpu.strided_load %arg3[%c0_7, %c0_8, %c0_9] {strides = array<i32: 2, 1, 1>} : memref<18x18x128xf32, #tpu.memory_space<vmem>>, vector<8x18x128xf32>
    %c1_10 = arith.constant 1 : index
    %c0_11 = arith.constant 0 : index
    %c0_12 = arith.constant 0 : index
    %5 = tpu.strided_load %arg3[%c1_10, %c0_11, %c0_12] {strides = array<i32: 2, 1, 1>} : memref<18x18x128xf32, #tpu.memory_space<vmem>>, vector<8x18x128xf32>
    %6 = arith.maximumf %4, %5 : vector<8x18x128xf32>
    %c2 = arith.constant 2 : index
    %c0_13 = arith.constant 0 : index
    %c0_14 = arith.constant 0 : index
    %7 = tpu.strided_load %arg3[%c2, %c0_13, %c0_14] {strides = array<i32: 2, 1, 1>} : memref<18x18x128xf32, #tpu.memory_space<vmem>>, vector<8x18x128xf32>
    %8 = arith.maximumf %6, %7 : vector<8x18x128xf32>
    %c0_15 = arith.constant 0 : index
    %c0_16 = arith.constant 0 : index
    %c0_17 = arith.constant 0 : index
    %9 = vector.load %arg4[%c0_15, %c0_16, %c0_17] : memref<8x18x128xf32, #tpu.memory_space<vmem>>, vector<8x18x128xf32>
    tpu.vector_store %arg4[%c0_15, %c0_16, %c0_17], %8 {strides = array<i32>} : memref<8x18x128xf32, #tpu.memory_space<vmem>>, vector<8x18x128xf32>,
    %c0_18 = arith.constant 0 : index
    %c0_19 = arith.constant 0 : index
    %c0_20 = arith.constant 0 : index
    %10 = tpu.strided_load %arg4[%c0_18, %c0_19, %c0_20] {strides = array<i32: 1, 2, 1>} : memref<8x18x128xf32, #tpu.memory_space<vmem>>, vector<8x8x128xf32>
    %c0_21 = arith.constant 0 : index
    %c1_22 = arith.constant 1 : index
    %c0_23 = arith.constant 0 : index
    %11 = tpu.strided_load %arg4[%c0_21, %c1_22, %c0_23] {strides = array<i32: 1, 2, 1>} : memref<8x18x128xf32, #tpu.memory_space<vmem>>, vector<8x8x128xf32>
    %12 = arith.maximumf %10, %11 : vector<8x8x128xf32>
    %c0_24 = arith.constant 0 : index
    %c2_25 = arith.constant 2 : index
    %c0_26 = arith.constant 0 : index
    %13 = tpu.strided_load %arg4[%c0_24, %c2_25, %c0_26] {strides = array<i32: 1, 2, 1>} : memref<8x18x128xf32, #tpu.memory_space<vmem>>, vector<8x8x128xf32>
    %14 = arith.maximumf %12, %13 : vector<8x8x128xf32>
    %c0_27 = arith.constant 0 : index
    %c0_28 = arith.constant 0 : index
    %c0_29 = arith.constant 0 : index
    %15 = vector.load %arg2[%c0_27, %c0_28, %c0_29] : memref<8x8x128xf32, #tpu.memory_space<vmem>>, vector<8x8x128xf32>
    tpu.vector_store %arg2[%c0_27, %c0_28, %c0_29], %14 {strides = array<i32>} : memref<8x8x128xf32, #tpu.memory_space<vmem>>, vector<8x8x128xf32>,
    return
  }
  func.func @transform_0(%arg0: i32) -> (i32, i32, i32) {
    %c0_i32 = arith.constant 0 : i32
    %c0_i32_0 = arith.constant 0 : i32
    %c0_i32_1 = arith.constant 0 : i32
    return %c0_i32, %c0_i32_0, %arg0 : i32, i32, i32
  }
  func.func @transform_1(%arg0: i32) -> (i32, i32, i32) {
    %c0_i32 = arith.constant 0 : i32
    %c0_i32_0 = arith.constant 0 : i32
    %c0_i32_1 = arith.constant 0 : i32
    return %c0_i32, %c0_i32_0, %arg0 : i32, i32, i32
  }
}

</mosaic_0001>

<bundles_post_ra>
// kernel: pool.1
= control target key start
LH: loop header
LB: loop body
LE: loop exit
PB: predicated region body
PF: predicated region fallthrough
CT: control target
= control target key end

     0   :  { %v348_v0 = vmov -inf   ;;  %s479_s0 = inlined_call_operand.vmem [shape: f32[16,16,128], index: 0, kind: input, shape index: {}]   ;;  %s480_s1 = inlined_call_operand.vmem [shape: f32[8,8,128], index: 1, kind: output, shape index: {}]  }
   0x1   :  { %11 = vst [vmem:[#allocation2 + $0x18] sm:$0xff] %v348_v0  ;;  %10 = vst [vmem:[#allocation2 + $0x10] sm:$0x3] %v348_v0  ;;  %v62_v1 = vld [vmem:[%s479_s0] sm:$0xff]  ;;  %v63_v2 = vld [vmem:[%s479_s0 + $0x8] sm:$0xff] }
   0x2   :  { %12 = vst [vmem:[#allocation2 + $0x20] sm:$0xff] %v348_v0  ;;  %13 = vst [vmem:[#allocation2 + $0x28] sm:$0x3] %v348_v0  ;;  %v64_v3 = vld [vmem:[%s479_s0 + $0x10] sm:$0xff]  ;;  %v65_v4 = vld [vmem:[%s479_s0 + $0x18] sm:$0xff] }
   0x3   :  { %14 = vst [vmem:[#allocation2 + $0x30] sm:$0xff] %v348_v0  ;;  %15 = vst [vmem:[#allocation2 + $0x38] sm:$0xff] %v348_v0  ;;  %v66_v5 = vld [vmem:[%s479_s0 + $0x20] sm:$0xff]  ;;  %v67_v6 = vld [vmem:[%s479_s0 + $0x28] sm:$0xff] }
   0x4   :  { %16 = vst [vmem:[#allocation2 + $0x40] sm:$0x3] %v348_v0  ;;  %17 = vst [vmem:[#allocation2 + $0x48] sm:$0xff] %v348_v0  ;;  %v68_v7 = vld [vmem:[%s479_s0 + $0x30] sm:$0xff]  ;;  %v69_v8 = vld [vmem:[%s479_s0 + $0x38] sm:$0xff] }
   0x5   :  { %18 = vst [vmem:[#allocation2 + $0x50] sm:$0xff] %v348_v0  ;;  %19 = vst [vmem:[#allocation2 + $0x58] sm:$0x3] %v348_v0  ;;  %v70_v9 = vld [vmem:[%s479_s0 + $0x40] sm:$0xff]  ;;  %v71_v10 = vld [vmem:[%s479_s0 + $0x48] sm:$0xff] }
   0x6   :  { %20 = vst [vmem:[#allocation2 + $0x60] sm:$0xff] %v348_v0  ;;  %21 = vst [vmem:[#allocation2 + $0x68] sm:$0xff] %v348_v0  ;;  %v72_v11 = vld [vmem:[%s479_s0 + $0x50] sm:$0xff]  ;;  %v73_v12 = vld [vmem:[%s479_s0 + $0x58] sm:$0xff] }
   0x7   :  { %22 = vst [vmem:[#allocation2 + $0x70] sm:$0x3] %v348_v0  ;;  %23 = vst [vmem:[#allocation2 + $0x78] sm:$0xff] %v348_v0  ;;  %v74_v13 = vld [vmem:[%s479_s0 + $0x60] sm:$0xff]  ;;  %v75_v14 = vld [vmem:[%s479_s0 + $0x68] sm:$0xff] }
   0x8   :  { %24 = vst [vmem:[#allocation2 + $0x80] sm:$0xff] %v348_v0  ;;  %25 = vst [vmem:[#allocation2 + $0x88] sm:$0x3] %v348_v0  ;;  %v76_v15 = vld [vmem:[%s479_s0 + $0x70] sm:$0xff]  ;;  %v77_v16 = vld [vmem:[%s479_s0 + $0x78] sm:$0xff] }
   0x9   :  { %26 = vst [vmem:[#allocation2 + $0x90] sm:$0xff] %v348_v0  ;;  %27 = vst [vmem:[#allocation2 + $0x98] sm:$0xff] %v348_v0  ;;  %v78_v17 = vld [vmem:[%s479_s0 + $0x80] sm:$0xff]  ;;  %v79_v18 = vld [vmem:[%s479_s0 + $0x88] sm:$0xff] }
   0xa   :  { %28 = vst [vmem:[#allocation2 + $0xa0] sm:$0x3] %v348_v0  ;;  %29 = vst [vmem:[#allocation2 + $0xa8] sm:$0xff] %v348_v0  ;;  %v80_v19 = vld [vmem:[%s479_s0 + $0x90] sm:$0xff]  ;;  %v81_v20 = vld [vmem:[%s479_s0 + $0x98] sm:$0xff] }
   0xb   :  { %30 = vst [vmem:[#allocation2 + $0xb0] sm:$0xff] %v348_v0  ;;  %31 = vst [vmem:[#allocation2 + $0xb8] sm:$0x3] %v348_v0  ;;  %v82_v21 = vld [vmem:[%s479_s0 + $0xa0] sm:$0xff]  ;;  %v83_v22 = vld [vmem:[%s479_s0 + $0xa8] sm:$0xff] }
   0xc   :  { %32 = vst [vmem:[#allocation2 + $0xc0] sm:$0xff] %v348_v0  ;;  %33 = vst [vmem:[#allocation2 + $0xc8] sm:$0xff] %v348_v0  ;;  %v84_v23 = vld [vmem:[%s479_s0 + $0xb0] sm:$0xff]  ;;  %v85_v24 = vld [vmem:[%s479_s0 + $0xb8] sm:$0xff] }
   0xd   :  { %34 = vst [vmem:[#allocation2 + $0xd0] sm:$0x3] %v348_v0  ;;  %35 = vst [vmem:[#allocation2 + $0xd8] sm:$0xff] %v348_v0  ;;  %v86_v25 = vld [vmem:[%s479_s0 + $0xc0] sm:$0xff]  ;;  %v87_v26 = vld [vmem:[%s479_s0 + $0xc8] sm:$0xff] }
   0xe   :  { %36 = vst [vmem:[#allocation2 + $0xe0] sm:$0xff] %v348_v0  ;;  %37 = vst [vmem:[#allocation2 + $0xe8] sm:$0x3] %v348_v0  ;;  %v88_v27 = vld [vmem:[%s479_s0 + $0xd0] sm:$0xff]  ;;  %v89_v28 = vld [vmem:[%s479_s0 + $0xd8] sm:$0xff] }
   0xf   :  { %38 = vst [vmem:[#allocation2 + $0xf0] sm:$0xff] %v348_v0  ;;  %39 = vst [vmem:[#allocation2 + $0xf8] sm:$0xff] %v348_v0  ;;  %v90_v29 = vld [vmem:[%s479_s0 + $0xe0] sm:$0xff]  ;;  %v91_v30 = vld [vmem:[%s479_s0 + $0xe8] sm:$0xff] }
  0x10   :  { %40 = vst [vmem:[#allocation2 + $0x100] sm:$0x3] %v348_v0  ;;  %41 = vst [vmem:[#allocation2 + $0x108] sm:$0xff] %v348_v0  ;;  %v92_v31 = vld [vmem:[%s479_s0 + $0xf0] sm:$0xff]  ;;  %v93_v32 = vld [vmem:[%s479_s0 + $0xf8] sm:$0xff] }
  0x11   :  { %42 = vst [vmem:[#allocation2 + $0x110] sm:$0xff] %v348_v0  ;;  %43 = vst [vmem:[#allocation2 + $0x118] sm:$0x3] %v348_v0  ;;  %v129_v37 = vld [vmem:[#allocation2 + $0x10] sm:$0x3] }
  0x12   :  { %44 = vst [vmem:[#allocation2 + $0x120] sm:$0xff] %v348_v0  ;;  %45 = vst [vmem:[#allocation2 + $0x128] sm:$0xff] %v348_v0 }
  0x13   :  { %46 = vst [vmem:[#allocation2 + $0x130] sm:$0x3] %v348_v0  ;;  %47 = vst [vmem:[#allocation2 + $0x138] sm:$0xff] %v348_v0 }
  0x14   :  { %48 = vst [vmem:[#allocation2 + $0x140] sm:$0xff] %v348_v0  ;;  %49 = vst [vmem:[#allocation2 + $0x148] sm:$0x3] %v348_v0 }
  0x15   :  { %50 = vst [vmem:[#allocation2 + $0x150] sm:$0xff] %v348_v0  ;;  %51 = vst [vmem:[#allocation2 + $0x158] sm:$0xff] %v348_v0 }
  0x16   :  { %52 = vst [vmem:[#allocation2 + $0x160] sm:$0x3] %v348_v0  ;;  %53 = vst [vmem:[#allocation2 + $0x168] sm:$0xff] %v348_v0 }
  0x17   :  { %54 = vst [vmem:[#allocation2 + $0x170] sm:$0xff] %v348_v0  ;;  %55 = vst [vmem:[#allocation2 + $0x178] sm:$0x3] %v348_v0 }
  0x18   :  { %56 = vst [vmem:[#allocation2 + $0x180] sm:$0xff] %v348_v0  ;;  %57 = vst [vmem:[#allocation2 + $0x188] sm:$0xff] %v348_v0 }
  0x19   :  { %58 = vst [vmem:[#allocation2 + $0x190] sm:$0x3] %v348_v0  ;;  %95 = vst [vmem:[#allocation2 + $0x19] sm:$0xff] %v62_v1 }
  0x1a   :  { %96 = vst [vmem:[#allocation2 + $0x21] sm:$0xff] %v63_v2  ;;  %97 = vst [vmem:[#allocation2 + $0x31] sm:$0xff] %v64_v3 }
  0x1b   :  { %98 = vst [vmem:[#allocation2 + $0x39] sm:$0xff] %v65_v4  ;;  %99 = vst [vmem:[#allocation2 + $0x49] sm:$0xff] %v66_v5 }
  0x1c   :  { %100 = vst [vmem:[#allocation2 + $0x51] sm:$0xff] %v67_v6  ;;  %101 = vst [vmem:[#allocation2 + $0x61] sm:$0xff] %v68_v7 }
  0x1d   :  { %102 = vst [vmem:[#allocation2 + $0x69] sm:$0xff] %v69_v8  ;;  %103 = vst [vmem:[#allocation2 + $0x79] sm:$0xff] %v70_v9 }
  0x1e   :  { %104 = vst [vmem:[#allocation2 + $0x81] sm:$0xff] %v71_v10  ;;  %105 = vst [vmem:[#allocation2 + $0x91] sm:$0xff] %v72_v11 }
  0x1f   :  { %106 = vst [vmem:[#allocation2 + $0x99] sm:$0xff] %v73_v12  ;;  %107 = vst [vmem:[#allocation2 + $0xa9] sm:$0xff] %v74_v13 }
  0x20   :  { %108 = vst [vmem:[#allocation2 + $0xb1] sm:$0xff] %v75_v14  ;;  %109 = vst [vmem:[#allocation2 + $0xc1] sm:$0xff] %v76_v15  ;;  %v151_v33 = vld [vmem:[#allocation2 + $0x18] sm:$0xff] }
  0x21   :  { %110 = vst [vmem:[#allocation2 + $0xc9] sm:$0xff] %v77_v16  ;;  %111 = vst [vmem:[#allocation2 + $0xd9] sm:$0xff] %v78_v17  ;;  %v200_v34 = vld [vmem:[#allocation2 + $0x30] sm:$0xff]  ;;  %v152_v35 = vld [vmem:[#allocation2 + $0x20] sm:$0xff] }
  0x22   :  { %112 = vst [vmem:[#allocation2 + $0xe1] sm:$0xff] %v79_v18  ;;  %113 = vst [vmem:[#allocation2 + $0xf1] sm:$0xff] %v80_v19  ;;  %v201_v36 = vld [vmem:[#allocation2 + $0x38] sm:$0xff]  ;;  %v153_v38 = vld [vmem:[#allocation2 + $0x28] sm:$0x3]  ;;  %v224_v40 = vmax.f32 %v151_v33, %v200_v34 }
  0x23   :  { %114 = vst [vmem:[#allocation2 + $0xf9] sm:$0xff] %v81_v20  ;;  %115 = vst [vmem:[#allocation2 + $0x109] sm:$0xff] %v82_v21  ;;  %v202_v39 = vld [vmem:[#allocation2 + $0x40] sm:$0x3]  ;;  %v177_v41 = vmax.f32 %v129_v37, %v153_v38  ;;  %v154_v42 = vld [vmem:[#allocation2 + $0x48] sm:$0xff]  ;;  %v225_v45 = vmax.f32 %v152_v35, %v201_v36 }
  0x24   :  { %116 = vst [vmem:[#allocation2 + $0x111] sm:$0xff] %v83_v22  ;;  %117 = vst [vmem:[#allocation2 + $0x121] sm:$0xff] %v84_v23  ;;  %v203_v43 = vld [vmem:[#allocation2 + $0x60] sm:$0xff]  ;;  %v155_v44 = vld [vmem:[#allocation2 + $0x50] sm:$0xff]  ;;  %v178_v46 = vmax.f32 %v200_v34, %v154_v42 }
  0x25   :  { %118 = vst [vmem:[#allocation2 + $0x129] sm:$0xff] %v85_v24  ;;  %119 = vst [vmem:[#allocation2 + $0x139] sm:$0xff] %v86_v25  ;;  %v179_v47 = vmax.f32 %v201_v36, %v155_v44  ;;  %v204_v48 = vld [vmem:[#allocation2 + $0x68] sm:$0xff]  ;;  %v132_v49 = vld [vmem:[#allocation2 + $0x40] sm:$0x3]  ;;  %v226_v51 = vmax.f32 %v177_v41, %v202_v39 }
  0x26   :  { %120 = vst [vmem:[#allocation2 + $0x141] sm:$0xff] %v87_v26  ;;  %121 = vst [vmem:[#allocation2 + $0x151] sm:$0xff] %v88_v27  ;;  %v156_v50 = vld [vmem:[#allocation2 + $0x58] sm:$0x3]  ;;  %v205_v53 = vld [vmem:[#allocation2 + $0x70] sm:$0x3]  ;;  %v227_v56 = vmax.f32 %v178_v46, %v203_v43 }
  0x27   :  { %122 = vst [vmem:[#allocation2 + $0x159] sm:$0xff] %v89_v28  ;;  %123 = vst [vmem:[#allocation2 + $0x169] sm:$0xff] %v90_v29  ;;  %v180_v52 = vmax.f32 %v132_v49, %v156_v50  ;;  %v157_v54 = vld [vmem:[#allocation2 + $0x78] sm:$0xff]  ;;  %v206_v55 = vld [vmem:[#allocation2 + $0x90] sm:$0xff]  ;;  %v228_v57 = vmax.f32 %v179_v47, %v204_v48 }
  0x28   :  { %124 = vst [vmem:[#allocation2 + $0x171] sm:$0xff] %v91_v30  ;;  %125 = vst [vmem:[#allocation2 + $0x181] sm:$0xff] %v92_v31  ;;  %v181_v58 = vmax.f32 %v203_v43, %v157_v54  ;;  %v158_v59 = vld [vmem:[#allocation2 + $0x80] sm:$0xff]  ;;  %v207_v60 = vld [vmem:[#allocation2 + $0x98] sm:$0xff] }
  0x29   :  { %126 = vst [vmem:[#allocation2 + $0x189] sm:$0xff] %v93_v32  ;;  %248 = vst [vmem:[#allocation3] sm:$0xff] %v224_v40  ;;  %v135_v61 = vld [vmem:[#allocation2 + $0x70] sm:$0x3]  ;;  %v229_v62 = vmax.f32 %v180_v52, %v205_v53  ;;  %v182_v63 = vmax.f32 %v204_v48, %v158_v59  ;;  %v159_v0 = vld [vmem:[#allocation2 + $0x88] sm:$0x3] }
  0x2a   :  { %249 = vst [vmem:[#allocation3 + $0x8] sm:$0xff] %v225_v45  ;;  %250 = vst [vmem:[#allocation3 + $0x10] sm:$0x3] %v226_v51  ;;  %v208_v1 = vld [vmem:[#allocation2 + $0xa0] sm:$0x3]  ;;  %v160_v2 = vld [vmem:[#allocation2 + $0xa8] sm:$0xff]  ;;  %v230_v3 = vmax.f32 %v181_v58, %v206_v55  ;;  %v183_v4 = vmax.f32 %v135_v61, %v159_v0 }
  0x2b   :  { %251 = vst [vmem:[#allocation3 + $0x18] sm:$0xff] %v227_v56  ;;  %252 = vst [vmem:[#allocation3 + $0x20] sm:$0xff] %v228_v57  ;;  %v184_v5 = vmax.f32 %v206_v55, %v160_v2  ;;  %v209_v6 = vld [vmem:[#allocation2 + $0xc0] sm:$0xff]  ;;  %v161_v7 = vld [vmem:[#allocation2 + $0xb0] sm:$0xff]  ;;  %v231_v9 = vmax.f32 %v182_v63, %v207_v60 }
  0x2c   :  { %v210_v8 = vld [vmem:[#allocation2 + $0xc8] sm:$0xff]  ;;  %253 = vst [vmem:[#allocation3 + $0x28] sm:$0x3] %v229_v62  ;;  %v185_v10 = vmax.f32 %v207_v60, %v161_v7  ;;  %v138_v11 = vld [vmem:[#allocation2 + $0xa0] sm:$0x3]  ;;  %254 = vst [vmem:[#allocation3 + $0x30] sm:$0xff] %v230_v3  ;;  %v232_v14 = vmax.f32 %v183_v4, %v208_v1 }
  0x2d   :  { %v162_v12 = vld [vmem:[#allocation2 + $0xb8] sm:$0x3]  ;;  %v211_v13 = vld [vmem:[#allocation2 + $0xd0] sm:$0x3]  ;;  %v233_v15 = vmax.f32 %v184_v5, %v209_v6  ;;  %v164_v19 = vld [vmem:[#allocation2 + $0xe0] sm:$0xff]  ;;  %255 = vst [vmem:[#allocation3 + $0x38] sm:$0xff] %v231_v9 }
  0x2e   :  { %v186_v16 = vmax.f32 %v138_v11, %v162_v12  ;;  %v163_v17 = vld [vmem:[#allocation2 + $0xd8] sm:$0xff]  ;;  %v212_v18 = vld [vmem:[#allocation2 + $0xf0] sm:$0xff]  ;;  %v234_v20 = vmax.f32 %v185_v10, %v210_v8  ;;  %v188_v22 = vmax.f32 %v210_v8, %v164_v19  ;;  %v165_v25 = vld [vmem:[#allocation2 + $0xe8] sm:$0x3]  ;;  %256 = vst [vmem:[#allocation3 + $0x40] sm:$0x3] %v232_v14 }
  0x2f   :  { %v187_v21 = vmax.f32 %v209_v6, %v163_v17  ;;  %v213_v23 = vld [vmem:[#allocation2 + $0xf8] sm:$0xff]  ;;  %v141_v24 = vld [vmem:[#allocation2 + $0xd0] sm:$0x3]  ;;  %257 = vst [vmem:[#allocation3 + $0x48] sm:$0xff] %v233_v15  ;;  %v214_v28 = vld [vmem:[#allocation2 + $0x100] sm:$0x3] }
  0x30   :  { %v235_v26 = vmax.f32 %v186_v16, %v211_v13  ;;  %v189_v27 = vmax.f32 %v141_v24, %v165_v25  ;;  %v166_v29 = vld [vmem:[#allocation2 + $0x108] sm:$0xff]  ;;  %v215_v30 = vld [vmem:[#allocation2 + $0x120] sm:$0xff]  ;;  %258 = vst [vmem:[#allocation3 + $0x50] sm:$0xff] %v234_v20  ;;  %v237_v32 = vmax.f32 %v188_v22, %v213_v23  ;;  %v167_v34 = vld [vmem:[#allocation2 + $0x110] sm:$0xff] }
  0x31   :  { %v236_v31 = vmax.f32 %v187_v21, %v212_v18  ;;  %v190_v33 = vmax.f32 %v212_v18, %v166_v29  ;;  %v216_v35 = vld [vmem:[#allocation2 + $0x128] sm:$0xff]  ;;  %v144_v36 = vld [vmem:[#allocation2 + $0x100] sm:$0x3]  ;;  %v191_v38 = vmax.f32 %v213_v23, %v167_v34  ;;  %v168_v39 = vld [vmem:[#allocation2 + $0x118] sm:$0x3] }
  0x32   :  { %259 = vst [vmem:[#allocation3 + $0x58] sm:$0x3] %v235_v26  ;;  %v238_v37 = vmax.f32 %v189_v27, %v214_v28  ;;  %v217_v40 = vld [vmem:[#allocation2 + $0x130] sm:$0x3]  ;;  %v169_v41 = vld [vmem:[#allocation2 + $0x138] sm:$0xff]  ;;  %261 = vst [vmem:[#allocation3 + $0x68] sm:$0xff] %v237_v32  ;;  %v192_v43 = vmax.f32 %v144_v36, %v168_v39 }
  0x33   :  { %260 = vst [vmem:[#allocation3 + $0x60] sm:$0xff] %v236_v31  ;;  %v239_v42 = vmax.f32 %v190_v33, %v215_v30  ;;  %v193_v44 = vmax.f32 %v215_v30, %v169_v41  ;;  %v218_v45 = vld [vmem:[#allocation2 + $0x150] sm:$0xff]  ;;  %v170_v46 = vld [vmem:[#allocation2 + $0x140] sm:$0xff]  ;;  %v219_v47 = vld [vmem:[#allocation2 + $0x158] sm:$0xff]  ;;  %v240_v48 = vmax.f32 %v191_v38, %v216_v35 }
  0x34   :  { %262 = vst [vmem:[#allocation3 + $0x70] sm:$0x3] %v238_v37  ;;  %v194_v49 = vmax.f32 %v216_v35, %v170_v46  ;;  %v147_v50 = vld [vmem:[#allocation2 + $0x130] sm:$0x3]  ;;  %v171_v51 = vld [vmem:[#allocation2 + $0x148] sm:$0x3]  ;;  %v241_v53 = vmax.f32 %v192_v43, %v217_v40 }
  0x35   :  { %v220_v52 = vld [vmem:[#allocation2 + $0x160] sm:$0x3]  ;;  %263 = vst [vmem:[#allocation3 + $0x78] sm:$0xff] %v239_v42  ;;  %v242_v54 = vmax.f32 %v193_v44, %v218_v45  ;;  %v195_v55 = vmax.f32 %v147_v50, %v171_v51  ;;  %v172_v56 = vld [vmem:[#allocation2 + $0x168] sm:$0xff]  ;;  %v173_v58 = vld [vmem:[#allocation2 + $0x170] sm:$0xff] }
  0x36   :  { %v221_v57 = vld [vmem:[#allocation2 + $0x180] sm:$0xff]  ;;  %264 = vst [vmem:[#allocation3 + $0x80] sm:$0xff] %v240_v48  ;;  %v243_v59 = vmax.f32 %v194_v49, %v219_v47  ;;  %v196_v60 = vmax.f32 %v218_v45, %v172_v56  ;;  %v197_v61 = vmax.f32 %v219_v47, %v173_v58  ;;  %v222_v62 = vld [vmem:[#allocation2 + $0x188] sm:$0xff]  ;;  %v174_v0 = vld [vmem:[#allocation2 + $0x178] sm:$0x3] }
  0x37   :  { %v150_v63 = vld [vmem:[#allocation2 + $0x160] sm:$0x3]  ;;  %265 = vst [vmem:[#allocation3 + $0x88] sm:$0x3] %v241_v53  ;;  %266 = vst [vmem:[#allocation3 + $0x90] sm:$0xff] %v242_v54  ;;  %v244_v1 = vmax.f32 %v195_v55, %v220_v52 }
  0x38   :  { %v198_v2 = vmax.f32 %v150_v63, %v174_v0  ;;  %v223_v3 = vld [vmem:[#allocation2 + $0x190] sm:$0x3]  ;;  %267 = vst [vmem:[#allocation3 + $0x98] sm:$0xff] %v243_v59  ;;  %v245_v6 = vmax.f32 %v196_v60, %v221_v57  ;;  %v246_v7 = vmax.f32 %v197_v61, %v222_v62  ;;  %v312_v12 = vld [vmem:[#allocation3 + $0x2] ss:$2 sm:$0xff] }
  0x39   :  { %v272_v4 = vld [vmem:[#allocation3] ss:$2 sm:$0xff]  ;;  %v288_v5 = vld [vmem:[#allocation3 + $0x1] ss:$2 sm:$0xff]  ;;  %268 = vst [vmem:[#allocation3 + $0xa0] sm:$0x3] %v244_v1 }
  0x3a   :  { %v303_v8 = vmax.f32 %v272_v4, %v288_v5  ;;  %v274_v9 = vld [vmem:[#allocation3 + $0x18] ss:$2 sm:$0xff]  ;;  %v290_v10 = vld [vmem:[#allocation3 + $0x19] ss:$2 sm:$0xff]  ;;  %v247_v11 = vmax.f32 %v198_v2, %v223_v3  ;;  %269 = vst [vmem:[#allocation3 + $0xa8] sm:$0xff] %v245_v6  ;;  %270 = vst [vmem:[#allocation3 + $0xb0] sm:$0xff] %v246_v7 }
  0x3b   :  { %v304_v13 = vmax.f32 %v274_v9, %v290_v10  ;;  %v276_v14 = vld [vmem:[#allocation3 + $0x30] ss:$2 sm:$0xff]  ;;  %v292_v15 = vld [vmem:[#allocation3 + $0x31] ss:$2 sm:$0xff]  ;;  %v280_v24 = vld [vmem:[#allocation3 + $0x60] ss:$2 sm:$0xff] }
  0x3c   :  { %v327_v16 = vmax.f32 %v303_v8, %v312_v12  ;;  %v314_v17 = vld [vmem:[#allocation3 + $0x1a] ss:$2 sm:$0xff]  ;;  %v305_v18 = vmax.f32 %v276_v14, %v292_v15  ;;  %v294_v20 = vld [vmem:[#allocation3 + $0x49] ss:$2 sm:$0xff]  ;;  %271 = vst [vmem:[#allocation3 + $0xb8] sm:$0x3] %v247_v11 }
  0x3d   :  { %v278_v19 = vld [vmem:[#allocation3 + $0x48] ss:$2 sm:$0xff]  ;;  %v328_v21 = vmax.f32 %v304_v13, %v314_v17  ;;  %v296_v25 = vld [vmem:[#allocation3 + $0x61] ss:$2 sm:$0xff]  ;;  %v282_v31 = vld [vmem:[#allocation3 + $0x78] ss:$2 sm:$0xff] }
  0x3e   :  { %v316_v22 = vld [vmem:[#allocation3 + $0x32] ss:$2 sm:$0xff]  ;;  %v306_v23 = vmax.f32 %v278_v19, %v294_v20  ;;  %335 = vst [vmem:[%s480_s1] sm:$0xff] %v327_v16  ;;  %v307_v28 = vmax.f32 %v280_v24, %v296_v25  ;;  %v320_v30 = vld [vmem:[#allocation3 + $0x62] ss:$2 sm:$0xff]  ;;  %v298_v32 = vld [vmem:[#allocation3 + $0x79] ss:$2 sm:$0xff] }
  0x3f   :  { %v329_v26 = vmax.f32 %v305_v18, %v316_v22  ;;  %v318_v27 = vld [vmem:[#allocation3 + $0x4a] ss:$2 sm:$0xff]  ;;  %336 = vst [vmem:[%s480_s1 + $0x8] sm:$0xff] %v328_v21  ;;  %v308_v34 = vmax.f32 %v282_v31, %v298_v32  ;;  %v322_v35 = vld [vmem:[#allocation3 + $0x7a] ss:$2 sm:$0xff] }
  0x40   :  { %v330_v29 = vmax.f32 %v306_v23, %v318_v27  ;;  %v331_v33 = vmax.f32 %v307_v28, %v320_v30  ;;  %v284_v36 = vld [vmem:[#allocation3 + $0x90] ss:$2 sm:$0xff]  ;;  %v300_v37 = vld [vmem:[#allocation3 + $0x91] ss:$2 sm:$0xff] }
  0x41   :  { %337 = vst [vmem:[%s480_s1 + $0x10] sm:$0xff] %v329_v26  ;;  %v332_v38 = vmax.f32 %v308_v34, %v322_v35  ;;  %v309_v39 = vmax.f32 %v284_v36, %v300_v37  ;;  %v324_v40 = vld [vmem:[#allocation3 + $0x92] ss:$2 sm:$0xff]  ;;  %v302_v42 = vld [vmem:[#allocation3 + $0xa9] ss:$2 sm:$0xff] }
  0x42   :  { %338 = vst [vmem:[%s480_s1 + $0x18] sm:$0xff] %v330_v29  ;;  %339 = vst [vmem:[%s480_s1 + $0x20] sm:$0xff] %v331_v33  ;;  %v286_v41 = vld [vmem:[#allocation3 + $0xa8] ss:$2 sm:$0xff] }
  0x43   :  { %340 = vst [vmem:[%s480_s1 + $0x28] sm:$0xff] %v332_v38  ;;  %v333_v43 = vmax.f32 %v309_v39, %v324_v40  ;;  %v310_v44 = vmax.f32 %v286_v41, %v302_v42  ;;  %v326_v45 = vld [vmem:[#allocation3 + $0xaa] ss:$2 sm:$0xff] }
  0x45   :  { %341 = vst [vmem:[%s480_s1 + $0x30] sm:$0xff] %v333_v43  ;;  %v334_v46 = vmax.f32 %v310_v44, %v326_v45 }
  0x47   :  { %342 = vst [vmem:[%s480_s1 + $0x38] sm:$0xff] %v334_v46 }

</bundles_post_ra>
